<compile_context>
chip_gen: v7x
topology: tpu7x:2x2x1
jax: 0.10.0
libtpu: 0.0.40
codegen_flags: <defaults>
</compile_context>

<pallas_src>
import jax
import jax.numpy as jnp
from jax import lax
from jax.experimental import pallas as pl
from jax.experimental.pallas import tpu as pltpu


def _mm(a, b):
    """MXU matmul contracting (a dim 1, b dim 0) with f32 accumulation."""
    return lax.dot_general(a, b, dimension_numbers=(((1,), (0,)), ((), ())),
                           preferred_element_type=jnp.float32)


def _soft_thresh_stacked(u2, theta, n):
    """Complex soft-threshold on stacked-real layout u2 = [ur | ui], [rows, 2n].

    scale = max(0, 1 - theta / |u|) applied to both halves.  |u|^2 is
    duplicated across both halves with one XLU lane-roll (shift by n = half
    the lane width); the rest is elementwise VPU + one EUP rsqrt.  eps keeps
    |u| == 0 mapping to exactly 0 (theta > 0 for lmbda > 0).
    """
    sq = u2 * u2                                       # [ur^2 | ui^2]
    mag2 = sq + pltpu.roll(sq, shift=n, axis=1)        # [|u|^2 | |u|^2]
    scale = jnp.maximum(0.0, 1.0 - theta * lax.rsqrt(mag2 + 1e-30))
    return scale * u2
    # TODO(synk): p>0 top-k branch of soft_threshold is unused by ISTA.forward
    #             (it always calls with p=0) and is not implemented in-kernel.


def make_ista_kernel(k, L, lmbda, n, rows):
    theta = float(lmbda) / float(L)
    # Two independent row sub-chunks let the LLO scheduler overlap chunk A's
    # VPU/EUP epilogue with chunk B's MXU pushes (the recurrence is strictly
    # serial per chunk, so this hides MXU drain / EUP latency at small tiles).
    nchunks = 2 if (rows >= 16 and rows % 16 == 0) else 1
    step = rows // nchunks

    def ista_kernel(c_ref, m_ref, x_ref):
        if k == 0:  # static; matches the PyTorch loop not executing
            x_ref[...] = jnp.zeros(x_ref.shape, jnp.float32)
            return

        M = m_ref[...]                                           # (2n, 2n)
        # Row-aligned (multiple-of-8) static slices of the lane-dense c tile.
        cs = [c_ref[pl.ds(i * step, step), :] for i in range(nchunks)]

        # Peeled iteration 0: x == 0  =>  u = c = A^H y / L.
        xs = tuple(_soft_thresh_stacked(c, theta, n) for c in cs)

        def body(_, xs):
            # x_{t+1} = soft_thresh(c + x_t @ M),  M = I - A^H A / L
            us = [c + _mm(x, M) for c, x in zip(cs, xs)]
            return tuple(_soft_thresh_stacked(u, theta, n) for u in us)

        # k is static and small -> fully unroll (no scf.for overhead; lets the
        # scheduler interleave the two chunks' MXU/VPU work across iterations).
        xs = lax.fori_loop(0, k - 1, body, xs, unroll=True)

        for i in range(nchunks):
            x_ref[pl.ds(i * step, step), :] = xs[i]

    return ista_kernel


def _round_up(x, mult):
    return ((x + mult - 1) // mult) * mult


def ista_pallas(y, A, k, L, lmbda):
    """y: [B, m, 2] (real/imag), A: [m, n, 2] (real/imag).

    Returns (x, 0, 0) with x: [B, n, 2], matching ISTA.forward.
    """
    B, m, _ = y.shape
    _, n, _ = A.shape
    yr, yi = y[..., 0], y[..., 1]
    Ar, Ai = A[..., 0], A[..., 1]

    # Lane-dense stacked-real forms (one-time wrapper work, loop-invariant).
    y2 = jnp.concatenate([yr, yi], axis=-1)                       # [B, 2m]
    # [yr|yi] @ W_bwd == A^H y (stacked real):  W_bwd = [[Ar, -Ai], [Ai, Ar]]
    W_bwd = jnp.concatenate(
        [jnp.concatenate([Ar, -Ai], axis=1),
         jnp.concatenate([Ai, Ar], axis=1)], axis=0)              # (2m, 2n)
    # [xr|xi] @ W_fwd == A x (stacked real):   W_fwd = [[Ar^T, Ai^T], [-Ai^T, Ar^T]]
    W_fwd = jnp.concatenate(
        [jnp.concatenate([Ar.T, Ai.T], axis=1),
         jnp.concatenate([-Ai.T, Ar.T], axis=1)], axis=0)         # (2n, 2m)

    # Loop-invariant operators, computed once at HIGHEST precision (error in
    # these is re-applied every iteration through the recurrence):
    #   M  = I - (A^H A)/L     (2n, 2n)
    #   c2 = (A^H y)/L         (B, 2n)  -- full-batch XLA matmul, hoisted out
    #                                      of the per-tile serial chain.
    G2 = jnp.matmul(W_fwd, W_bwd, precision=lax.Precision.HIGHEST)
    M = (jnp.eye(2 * n, dtype=jnp.float32) - G2 / L).astype(jnp.float32)
    c2 = (jnp.matmul(y2, W_bwd, precision=lax.Precision.HIGHEST) / L
          ).astype(jnp.float32)                                    # [B, 2n]

    # Batch tiling: big tiles amortize per-grid-step overhead; mid-size B is
    # split into >= 2 grid steps (multiple-of-8 rows) so both v7x TensorCores
    # get work under "parallel" semantics.  M stays resident (index_map (0,0)).
    cap = 2048
    if B <= 8:
        bB = B                      # full-array block (exempt from /8 rule)
    elif B <= 2 * cap:
        bB = min(_round_up((B + 1) // 2, 8), _round_up(B, 8))
    else:
        bB = cap
    grid = (pl.cdiv(B, bB),)

    grid_spec = pltpu.PrefetchScalarGridSpec(
        num_scalar_prefetch=0,
        grid=grid,
        in_specs=[
            pl.BlockSpec((bB, 2 * n), lambda i: (i, 0)),      # c tile
            # Loop-invariant operator, VMEM-resident across all grid steps.
            # (Single-buffering via pipeline_mode is unnecessary headroom at
            #  these sizes; revisit for very large n on v7x's 64 MiB VMEM.)
            pl.BlockSpec((2 * n, 2 * n), lambda i: (0, 0)),   # M (resident)
        ],
        out_specs=pl.BlockSpec((bB, 2 * n), lambda i: (i, 0)),
    )

    x2 = pl.pallas_call(
        make_ista_kernel(k, L, lmbda, n, bB),
        out_shape=jax.ShapeDtypeStruct((B, 2 * n), jnp.float32),
        grid_spec=grid_spec,
        compiler_params=pltpu.CompilerParams(
            dimension_semantics=("parallel",),
            # Explicit scoped-VMEM limit (v5e default is only 16 MiB); with
            # bB=2048 the double-buffered working set is still only ~5 MiB.
            vmem_limit_bytes=32 * 1024 * 1024,
        ),
    )(c2, M)

    x = jnp.stack([x2[:, :n], x2[:, n:]], axis=-1)  # [B, n, 2] (real, imag)
    return x, 0, 0


# ---------------- pure-JAX reference (mirrors the PyTorch code) ----------------
def ista_ref(y, A, k, L, lmbda):
    yr, yi = y[..., 0], y[..., 1]
    Ar, Ai = A[..., 0], A[..., 1]
    B, m = yr.shape
    n = Ar.shape[1]
    xr = jnp.zeros((B, n), jnp.float32)
    xi = jnp.zeros((B, n), jnp.float32)
    theta = lmbda / L
    for _ in range(k):
        fr = xr @ Ar.T - xi @ Ai.T
        fi = xr @ Ai.T + xi @ Ar.T
        ar_, ai_ = yr - fr, yi - fi
        br = ar_ @ Ar + ai_ @ Ai
        bi = ai_ @ Ar - ar_ @ Ai
        ur = xr + br / L
        ui = xi + bi / L
        arg = jnp.arctan2(ui, ur)
        mag = jnp.sqrt(ur * ur + ui * ui)
        r = jnp.maximum(0.0, mag - theta)
        xr = r * jnp.cos(arg)
        xi = r * jnp.sin(arg)
    return jnp.stack([xr, xi], axis=-1)


if __name__ == "__main__":
    B, m, n = 8, 32, 64      # small shapes: batch=8, measurements m=32, signal n=64
    k, L, lmbda = 6, 4.0, 0.1

    key = jax.random.PRNGKey(0)
    ky, ka = jax.random.split(key)
    y = jax.random.normal(ky, (B, m, 2), dtype=jnp.float32)
    A = 0.1 * jax.random.normal(ka, (m, n, 2), dtype=jnp.float32)

    x, _, _ = ista_pallas(y, A, k, L, lmbda)
    x = jax.block_until_ready(x)

    x_ref = jax.block_until_ready(ista_ref(y, A, k, L, lmbda))
    assert x.shape == (B, n, 2)
    err = float(jnp.max(jnp.abs(x - x_ref)))
    assert err < 1e-3, err

    print("KERNEL_OK")
</pallas_src>

<mosaic_0001>
module attributes {stable_mosaic.version = 11 : i64} {
  func.func @ista_kernel(%arg0: i32, %arg1: memref<8x128xf32, #tpu.memory_space<vmem>>, %arg2: memref<128x128xf32, #tpu.memory_space<vmem>>, %arg3: memref<8x128xf32, #tpu.memory_space<vmem>>) attributes {dimension_semantics = [#tpu.dimension_semantics<parallel>], iteration_bounds = array<i64: 1>, scalar_prefetch = 0 : i64, scratch_operands = 0 : i64, tpu.core_type = #tpu.core_type<tc>, window_params = [{transform_indices = @transform_0, window_bounds = array<i64: 8, 128>}, {pipeline_mode = #tpu.pipeline_mode<synchronous>, transform_indices = @transform_1, window_bounds = array<i64: 128, 128>}, {transform_indices = @transform_2, window_bounds = array<i64: 8, 128>}]} {
    %c0 = arith.constant 0 : index
    %c0_0 = arith.constant 0 : index
    %0 = vector.load %arg2[%c0, %c0_0] : memref<128x128xf32, #tpu.memory_space<vmem>>, vector<128x128xf32>
    %c0_1 = arith.constant 0 : index
    %c0_2 = arith.constant 0 : index
    %1 = vector.load %arg1[%c0_1, %c0_2] : memref<8x128xf32, #tpu.memory_space<vmem>>, vector<8x128xf32>
    %2 = arith.mulf %1, %1 : vector<8x128xf32>
    %c64_i32 = arith.constant 64 : i32
    %3 = tpu.dynamic_rotate %2 by %c64_i32 dim 1 : vector<8x128xf32>, i32 -> vector<8x128xf32>
    %4 = arith.addf %2, %3 : vector<8x128xf32>
    %cst = arith.constant 1.000000e-30 : f32
    %5 = vector.broadcast %cst : f32 to vector<8x128xf32>
    %6 = arith.addf %4, %5 : vector<8x128xf32>
    %7 = math.rsqrt %6 : vector<8x128xf32>
    %cst_3 = arith.constant 2.500000e-02 : f32
    %8 = vector.broadcast %cst_3 : f32 to vector<8x128xf32>
    %9 = arith.mulf %8, %7 : vector<8x128xf32>
    %cst_4 = arith.constant 1.000000e+00 : f32
    %10 = vector.broadcast %cst_4 : f32 to vector<8x128xf32>
    %11 = arith.subf %10, %9 : vector<8x128xf32>
    %cst_5 = arith.constant 0.000000e+00 : f32
    %12 = vector.broadcast %cst_5 : f32 to vector<8x128xf32>
    %13 = arith.maximumf %12, %11 : vector<8x128xf32>
    %14 = arith.mulf %13, %1 : vector<8x128xf32>
    %c0_i32 = arith.constant 0 : i32
    %cst_6 = arith.constant dense<0.000000e+00> : vector<8x128xf32>
    %15 = tpu.matmul %14, %0, %cst_6 {dimension_numbers = #tpu.dot_dimension_numbers<[1], [0], [0], [1], [0, 0, 1, 1], [], []>} : vector<8x128xf32>, vector<128x128xf32>, vector<8x128xf32> -> vector<8x128xf32>
    %16 = arith.addf %1, %15 : vector<8x128xf32>
    %17 = arith.mulf %16, %16 : vector<8x128xf32>
    %c64_i32_7 = arith.constant 64 : i32
    %18 = tpu.dynamic_rotate %17 by %c64_i32_7 dim 1 : vector<8x128xf32>, i32 -> vector<8x128xf32>
    %19 = arith.addf %17, %18 : vector<8x128xf32>
    %cst_8 = arith.constant 1.000000e-30 : f32
    %20 = vector.broadcast %cst_8 : f32 to vector<8x128xf32>
    %21 = arith.addf %19, %20 : vector<8x128xf32>
    %22 = math.rsqrt %21 : vector<8x128xf32>
    %cst_9 = arith.constant 2.500000e-02 : f32
    %23 = vector.broadcast %cst_9 : f32 to vector<8x128xf32>
    %24 = arith.mulf %23, %22 : vector<8x128xf32>
    %cst_10 = arith.constant 1.000000e+00 : f32
    %25 = vector.broadcast %cst_10 : f32 to vector<8x128xf32>
    %26 = arith.subf %25, %24 : vector<8x128xf32>
    %cst_11 = arith.constant 0.000000e+00 : f32
    %27 = vector.broadcast %cst_11 : f32 to vector<8x128xf32>
    %28 = arith.maximumf %27, %26 : vector<8x128xf32>
    %29 = arith.mulf %28, %16 : vector<8x128xf32>
    %c1_i32 = arith.constant 1 : i32
    %cst_12 = arith.constant dense<0.000000e+00> : vector<8x128xf32>
    %30 = tpu.matmul %29, %0, %cst_12 {dimension_numbers = #tpu.dot_dimension_numbers<[1], [0], [0], [1], [0, 0, 1, 1], [], []>} : vector<8x128xf32>, vector<128x128xf32>, vector<8x128xf32> -> vector<8x128xf32>
    %31 = arith.addf %1, %30 : vector<8x128xf32>
    %32 = arith.mulf %31, %31 : vector<8x128xf32>
    %c64_i32_13 = arith.constant 64 : i32
    %33 = tpu.dynamic_rotate %32 by %c64_i32_13 dim 1 : vector<8x128xf32>, i32 -> vector<8x128xf32>
    %34 = arith.addf %32, %33 : vector<8x128xf32>
    %cst_14 = arith.constant 1.000000e-30 : f32
    %35 = vector.broadcast %cst_14 : f32 to vector<8x128xf32>
    %36 = arith.addf %34, %35 : vector<8x128xf32>
    %37 = math.rsqrt %36 : vector<8x128xf32>
    %cst_15 = arith.constant 2.500000e-02 : f32
    %38 = vector.broadcast %cst_15 : f32 to vector<8x128xf32>
    %39 = arith.mulf %38, %37 : vector<8x128xf32>
    %cst_16 = arith.constant 1.000000e+00 : f32
    %40 = vector.broadcast %cst_16 : f32 to vector<8x128xf32>
    %41 = arith.subf %40, %39 : vector<8x128xf32>
    %cst_17 = arith.constant 0.000000e+00 : f32
    %42 = vector.broadcast %cst_17 : f32 to vector<8x128xf32>
    %43 = arith.maximumf %42, %41 : vector<8x128xf32>
    %44 = arith.mulf %43, %31 : vector<8x128xf32>
    %c2_i32 = arith.constant 2 : i32
    %cst_18 = arith.constant dense<0.000000e+00> : vector<8x128xf32>
    %45 = tpu.matmul %44, %0, %cst_18 {dimension_numbers = #tpu.dot_dimension_numbers<[1], [0], [0], [1], [0, 0, 1, 1], [], []>} : vector<8x128xf32>, vector<128x128xf32>, vector<8x128xf32> -> vector<8x128xf32>
    %46 = arith.addf %1, %45 : vector<8x128xf32>
    %47 = arith.mulf %46, %46 : vector<8x128xf32>
    %c64_i32_19 = arith.constant 64 : i32
    %48 = tpu.dynamic_rotate %47 by %c64_i32_19 dim 1 : vector<8x128xf32>, i32 -> vector<8x128xf32>
    %49 = arith.addf %47, %48 : vector<8x128xf32>
    %cst_20 = arith.constant 1.000000e-30 : f32
    %50 = vector.broadcast %cst_20 : f32 to vector<8x128xf32>
    %51 = arith.addf %49, %50 : vector<8x128xf32>
    %52 = math.rsqrt %51 : vector<8x128xf32>
    %cst_21 = arith.constant 2.500000e-02 : f32
    %53 = vector.broadcast %cst_21 : f32 to vector<8x128xf32>
    %54 = arith.mulf %53, %52 : vector<8x128xf32>
    %cst_22 = arith.constant 1.000000e+00 : f32
    %55 = vector.broadcast %cst_22 : f32 to vector<8x128xf32>
    %56 = arith.subf %55, %54 : vector<8x128xf32>
    %cst_23 = arith.constant 0.000000e+00 : f32
    %57 = vector.broadcast %cst_23 : f32 to vector<8x128xf32>
    %58 = arith.maximumf %57, %56 : vector<8x128xf32>
    %59 = arith.mulf %58, %46 : vector<8x128xf32>
    %c3_i32 = arith.constant 3 : i32
    %cst_24 = arith.constant dense<0.000000e+00> : vector<8x128xf32>
    %60 = tpu.matmul %59, %0, %cst_24 {dimension_numbers = #tpu.dot_dimension_numbers<[1], [0], [0], [1], [0, 0, 1, 1], [], []>} : vector<8x128xf32>, vector<128x128xf32>, vector<8x128xf32> -> vector<8x128xf32>
    %61 = arith.addf %1, %60 : vector<8x128xf32>
    %62 = arith.mulf %61, %61 : vector<8x128xf32>
    %c64_i32_25 = arith.constant 64 : i32
    %63 = tpu.dynamic_rotate %62 by %c64_i32_25 dim 1 : vector<8x128xf32>, i32 -> vector<8x128xf32>
    %64 = arith.addf %62, %63 : vector<8x128xf32>
    %cst_26 = arith.constant 1.000000e-30 : f32
    %65 = vector.broadcast %cst_26 : f32 to vector<8x128xf32>
    %66 = arith.addf %64, %65 : vector<8x128xf32>
    %67 = math.rsqrt %66 : vector<8x128xf32>
    %cst_27 = arith.constant 2.500000e-02 : f32
    %68 = vector.broadcast %cst_27 : f32 to vector<8x128xf32>
    %69 = arith.mulf %68, %67 : vector<8x128xf32>
    %cst_28 = arith.constant 1.000000e+00 : f32
    %70 = vector.broadcast %cst_28 : f32 to vector<8x128xf32>
    %71 = arith.subf %70, %69 : vector<8x128xf32>
    %cst_29 = arith.constant 0.000000e+00 : f32
    %72 = vector.broadcast %cst_29 : f32 to vector<8x128xf32>
    %73 = arith.maximumf %72, %71 : vector<8x128xf32>
    %74 = arith.mulf %73, %61 : vector<8x128xf32>
    %c4_i32 = arith.constant 4 : i32
    %cst_30 = arith.constant dense<0.000000e+00> : vector<8x128xf32>
    %75 = tpu.matmul %74, %0, %cst_30 {dimension_numbers = #tpu.dot_dimension_numbers<[1], [0], [0], [1], [0, 0, 1, 1], [], []>} : vector<8x128xf32>, vector<128x128xf32>, vector<8x128xf32> -> vector<8x128xf32>
    %76 = arith.addf %1, %75 : vector<8x128xf32>
    %77 = arith.mulf %76, %76 : vector<8x128xf32>
    %c64_i32_31 = arith.constant 64 : i32
    %78 = tpu.dynamic_rotate %77 by %c64_i32_31 dim 1 : vector<8x128xf32>, i32 -> vector<8x128xf32>
    %79 = arith.addf %77, %78 : vector<8x128xf32>
    %cst_32 = arith.constant 1.000000e-30 : f32
    %80 = vector.broadcast %cst_32 : f32 to vector<8x128xf32>
    %81 = arith.addf %79, %80 : vector<8x128xf32>
    %82 = math.rsqrt %81 : vector<8x128xf32>
    %cst_33 = arith.constant 2.500000e-02 : f32
    %83 = vector.broadcast %cst_33 : f32 to vector<8x128xf32>
    %84 = arith.mulf %83, %82 : vector<8x128xf32>
    %cst_34 = arith.constant 1.000000e+00 : f32
    %85 = vector.broadcast %cst_34 : f32 to vector<8x128xf32>
    %86 = arith.subf %85, %84 : vector<8x128xf32>
    %cst_35 = arith.constant 0.000000e+00 : f32
    %87 = vector.broadcast %cst_35 : f32 to vector<8x128xf32>
    %88 = arith.maximumf %87, %86 : vector<8x128xf32>
    %89 = arith.mulf %88, %76 : vector<8x128xf32>
    %c0_36 = arith.constant 0 : index
    %c0_37 = arith.constant 0 : index
    %90 = vector.load %arg3[%c0_36, %c0_37] : memref<8x128xf32, #tpu.memory_space<vmem>>, vector<8x128xf32>
    tpu.vector_store %arg3[%c0_36, %c0_37], %89 {strides = array<i32>} : memref<8x128xf32, #tpu.memory_space<vmem>>, vector<8x128xf32>,
    return
  }
  func.func @transform_0(%arg0: i32) -> (i32, i32) {
    %c0_i32 = arith.constant 0 : i32
    %c0_i32_0 = arith.constant 0 : i32
    return %arg0, %c0_i32 : i32, i32
  }
  func.func @transform_1(%arg0: i32) -> (i32, i32) {
    %c0_i32 = arith.constant 0 : i32
    %c0_i32_0 = arith.constant 0 : i32
    %c0_i32_1 = arith.constant 0 : i32
    return %c0_i32, %c0_i32_0 : i32, i32
  }
  func.func @transform_2(%arg0: i32) -> (i32, i32) {
    %c0_i32 = arith.constant 0 : i32
    %c0_i32_0 = arith.constant 0 : i32
    return %arg0, %c0_i32 : i32, i32
  }
}

</mosaic_0001>

<bundles_post_ra>
// kernel: tpu_custom_call.1
= control target key start
LH: loop header
LB: loop body
LE: loop exit
PB: predicated region body
PF: predicated region fallthrough
CT: control target
= control target key end

     0   :  { %7 = vsyncpa [#allocation3], 0  ;;  %s1149_s0 = inlined_call_operand.hbm [shape: f32[8,128], index: 0, kind: input, shape index: {}]   ;;  %s1150_s1 = inlined_call_operand.hbm [shape: f32[128,128], index: 1, kind: input, shape index: {}]   ;;  %s1151_s2 = inlined_call_operand.hbm [shape: f32[8,128], index: 2, kind: output, shape index: {}]  }
   0x1   :  { %8 = vsyncpa [#allocation6], 0 }
   0x2   :  { %9 = vsyncpa [#allocation4], 0  ;;  %s960_s9 = smov [#allocation2]   ;;  %s961_s11 = smov [#allocation5]  }
   0x3   :  { %s16_s10 = sshll.u32 %s960_s9, 4  ;;  %s25_s12 = sshll.u32 %s961_s11, 4  ;;  %s17_s10 = int_to_ptr.vmem [resolvable:$true] %s16_s10  ;;  %s984_s12 = int_to_ptr.vmem [resolvable:$true] %s25_s12 }
   0x4   :  { %s888_s15 = scalar_lea.hbm %s1149_s0, 128 }
   0x5   :  { %p889_p0 = scmp.ne.s32.totalorder %s1149_s0, %s888_s15  ;;  %p892_p1 = scmp.lt.u32.totalorder %s888_s15, %s1149_s0 }
   0x7   :  { %p894_p2 = pnand %p892_p1, %p889_p0 }
   0x9   :  { %897 = shalt.err (!%p894_p2)
}
   0xa   :  { %s898_s20 = scalar_lea.vmem %s17_s10, 128  ;;  %p903_p4 = scmp.lt.s32.totalorder %s17_s10, %s17_s10 }
   0xb   :  { %p899_p3 = scmp.ne.s32.totalorder %s17_s10, %s898_s20  ;;  %p904_p5 = scmp.lt.s32.totalorder %s898_s20, %s898_s20 }
   0xd   :  { %p905_p6 = por %p904_p5, %p903_p4 }
   0xf   :  { %p906_p7 = pnand %p905_p6, %p899_p3 }
  0x11   :  { %909 = shalt.err (!%p906_p7)
}
  0x12   :  { %19 = dma.hbm_to_vmem [thread:$0]  %s1149_s0, 128, %s17_s10, [#allocation3]  }
  0x13   :  { %s910_s25 = scalar_lea.hbm %s1150_s1, 2048 }
  0x14   :  { %p911_p8 = scmp.ne.s32.totalorder %s1150_s1, %s910_s25  ;;  %p914_p9 = scmp.lt.u32.totalorder %s910_s25, %s1150_s1 }
  0x16   :  { %p916_p10 = pnand %p914_p9, %p911_p8 }
  0x18   :  { %919 = shalt.err (!%p916_p10)
}
  0x19   :  { %s920_s30 = scalar_lea.vmem %s984_s12, 2048  ;;  %p925_p12 = scmp.lt.s32.totalorder %s984_s12, %s984_s12 }
  0x1a   :  { %p921_p11 = scmp.ne.s32.totalorder %s984_s12, %s920_s30  ;;  %p926_p13 = scmp.lt.s32.totalorder %s920_s30, %s920_s30 }
  0x1c   :  { %p927_p0 = por %p926_p13, %p925_p12 }
  0x1e   :  { %p928_p1 = pnand %p927_p0, %p921_p11 }
  0x20   :  { %931 = shalt.err (!%p928_p1)
}
  0x21   :  { %s962_s0 = smov 128   ;;  %s963_s3 = smov 8  }
  0x22   :  { %31 = dma.hbm_to_vmem [thread:$0]  %s1150_s1, 2048, %s984_s12, [#allocation6], %s962_s0, %s962_s0, %s963_s3  }
  0x23   :  { %954 = dma.done.wait [#allocation3], 128  }
  0x24   :  { %955 = vsyncadd [#allocation3], 4294967168 }
  0x25   :  { %956 = dma.done.wait [#allocation6], 2048  }
  0x26   :  { %957 = vsyncadd [#allocation6], 4294965248  ;;  %v964_v0 = vmov 0.0|0.0   ;;  %v1017_v1 = vld [vmem:[#allocation2] sm:$0xff]  ;;  %v38_v2 = vld [vmem:[#allocation5] sm:$0xff]  ;;  %s965_s1 = smov 64  }
  0x27   :  { %747 = vmatprep.subr.bf16.mxu0 %v964_v0  ;;  %771 = vmatprep.subr.bf16.mxu1 %v964_v0  ;;  %v39_v3 = vld [vmem:[#allocation5 + $0x8] sm:$0xff]  ;;  %v55_v4 = vmul.f32 %v1017_v1, %v1017_v1  ;;  %v40_v6 = vld [vmem:[#allocation5 + $0x10] sm:$0xff]  ;;  %v41_v7 = vld [vmem:[#allocation5 + $0x18] sm:$0xff]  ;;  %vm966_vm0 = vmmov 0   ;;  %v967_v14 = vmov 0.0   ;;  %s968_s6 = smov [#allocation7]  }
  0x28   :  { %v1021_v5 = vpack.c.bf16 %v39_v3, %v38_v2  ;;  %v1025_v8 = vpack.c.bf16 %v41_v7, %v40_v6  ;;  %v42_v9 = vld [vmem:[#allocation5 + $0x20] sm:$0xff]  ;;  %v43_v10 = vld [vmem:[#allocation5 + $0x28] sm:$0xff]  ;;  %v44_v12 = vld [vmem:[#allocation5 + $0x30] sm:$0xff]  ;;  %604 = vmatprep.mubr.msk.f32.mxu0 %vm966_vm0, %v967_v14  ;;  %639 = vmatprep.mubr.msk.f32.mxu1 %vm966_vm0, %v967_v14  ;;  %s477_s7 = sshll.u32 %s968_s6, 4  ;;  %s478_s7 = int_to_ptr.vmem [resolvable:$true] %s477_s7 }
  0x29   :  { %56 = vrot.lane.b32.xlu0 %v55_v4, %s965_s1  ;;  %v1031_v11 = vpack.c.bf16 %v43_v10, %v42_v9  ;;  %v45_v13 = vld [vmem:[#allocation5 + $0x38] sm:$0xff]  ;;  %v46_v16 = vld [vmem:[#allocation5 + $0x40] sm:$0xff]  ;;  %v47_v17 = vld [vmem:[#allocation5 + $0x48] sm:$0xff]  ;;  %s932_s8 = scalar_lea.vmem %s478_s7, 128  ;;  %p937_p3 = scmp.lt.s32.totalorder %s478_s7, %s478_s7 }
  0x2a   :  { %749 = vmatpush3.bf16.msra.mxu0 %v1021_v5  ;;  %773 = vmatpush3.bf16.msra.mxu1 %v1021_v5  ;;  %v1041_v15 = vpack.c.bf16 %v45_v13, %v44_v12  ;;  %v1047_v18 = vpack.c.bf16 %v47_v17, %v46_v16  ;;  %v48_v19 = vld [vmem:[#allocation5 + $0x50] sm:$0xff]  ;;  %v49_v20 = vld [vmem:[#allocation5 + $0x58] sm:$0xff]  ;;  %v50_v22 = vld [vmem:[#allocation5 + $0x60] sm:$0xff]  ;;  %p933_p2 = scmp.ne.s32.totalorder %s478_s7, %s932_s8  ;;  %p938_p4 = scmp.lt.s32.totalorder %s932_s8, %s932_s8 }
  0x2b   :  { %750 = vmatprep.subr.bf16.mxu0 %v964_v0  ;;  %774 = vmatprep.subr.bf16.mxu1 %v964_v0  ;;  %v1053_v21 = vpack.c.bf16 %v49_v20, %v48_v19  ;;  %v51_v23 = vld [vmem:[#allocation5 + $0x68] sm:$0xff]  ;;  %v52_v25 = vld [vmem:[#allocation5 + $0x70] sm:$0xff]  ;;  %v53_v26 = vld [vmem:[#allocation5 + $0x78] sm:$0xff] }
  0x2c   :  { %v1059_v24 = vpack.c.bf16 %v51_v23, %v50_v22  ;;  %v1065_v27 = vpack.c.bf16 %v53_v26, %v52_v25  ;;  %p939_p5 = por %p938_p4, %p937_p3 }
  0x2e   :  { %752 = vmatpush3.bf16.msra.mxu0 %v1025_v8  ;;  %776 = vmatpush3.bf16.msra.mxu1 %v1025_v8  ;;  %p940_p6 = pnand %p939_p5, %p933_p2 }
  0x2f   :  { %753 = vmatprep.subr.bf16.mxu0 %v964_v0  ;;  %777 = vmatprep.subr.bf16.mxu1 %v964_v0 }
  0x32   :  { %755 = vmatpush3.bf16.msra.mxu0 %v1031_v11  ;;  %779 = vmatpush3.bf16.msra.mxu1 %v1031_v11 }
  0x33   :  { %756 = vmatprep.subr.bf16.mxu0 %v964_v0  ;;  %780 = vmatprep.subr.bf16.mxu1 %v964_v0 }
  0x36   :  { %758 = vmatpush3.bf16.msra.mxu0 %v1041_v15  ;;  %782 = vmatpush3.bf16.msra.mxu1 %v1041_v15 }
  0x37   :  { %759 = vmatprep.subr.bf16.mxu0 %v964_v0  ;;  %783 = vmatprep.subr.bf16.mxu1 %v964_v0 }
  0x3a   :  { %761 = vmatpush3.bf16.msra.mxu0 %v1047_v18  ;;  %785 = vmatpush3.bf16.msra.mxu1 %v1047_v18 }
  0x3b   :  { %762 = vmatprep.subr.bf16.mxu0 %v964_v0  ;;  %786 = vmatprep.subr.bf16.mxu1 %v964_v0 }
  0x3e   :  { %764 = vmatpush3.bf16.msra.mxu0 %v1053_v21  ;;  %788 = vmatpush3.bf16.msra.mxu1 %v1053_v21 }
  0x3f   :  { %765 = vmatprep.subr.bf16.mxu0 %v964_v0  ;;  %789 = vmatprep.subr.bf16.mxu1 %v964_v0 }
  0x42   :  { %767 = vmatpush3.bf16.msra.mxu0 %v1059_v24  ;;  %791 = vmatpush3.bf16.msra.mxu1 %v1059_v24 }
  0x43   :  { %768 = vmatprep.subr.bf16.mxu0 %v964_v0  ;;  %792 = vmatprep.subr.bf16.mxu1 %v964_v0 }
  0x46   :  { %770 = vmatpush3.bf16.msra.mxu0 %v1065_v27  ;;  %794 = vmatpush3.bf16.msra.mxu1 %v1065_v27 }
  0x47   :  { %795 = vmatprep.subr.bf16.mxu0 %v964_v0  ;;  %819 = vmatprep.subr.bf16.mxu1 %v964_v0 }
  0x9b   :  { %v57_v28 = vpop.permute.xlu0 %56 }
  0x9c   :  { %v58_v29 = vadd.f32 %v57_v28, %v55_v4 }
  0x9e   :  { %v59_v30 = vadd.f32 1e-30, %v58_v29 }
  0xa0   :  { %876 = vrsqrt.f32 %v59_v30 }
  0xaa   :  { %v877_v31 = vpop.eup %876 }
  0xab   :  { %v61_v32 = vmul.f32 0.025, %v877_v31 }
  0xad   :  { %v62_v33 = vsub.f32 1.0, %v61_v32 }
  0xaf   :  { %v63_v34 = vmax.f32 %v62_v33, 0.0 }
  0xb1   :  { %v64_v35 = vmul.f32 %v63_v34, %v1017_v1 }
  0xb3   :  { %605 = vmatmul.mubr.f32.vlgmr.msra.gmra.mrb[0].mxu0 %v64_v35 }
  0xb4   :  { %797 = vmatpush3.bf16.msra.mxu0 %v1021_v5  ;;  %674 = vmatprep.mubr.msk.f32.mxu0 %vm966_vm0, %v967_v14 }
  0xb5   :  { %798 = vmatprep.subr.bf16.mxu0 %v964_v0 }
  0xb8   :  { %800 = vmatpush3.bf16.msra.mxu0 %v1025_v8 }
  0xb9   :  { %801 = vmatprep.subr.bf16.mxu0 %v964_v0 }
  0xbc   :  { %803 = vmatpush3.bf16.msra.mxu0 %v1031_v11 }
  0xbd   :  { %804 = vmatprep.subr.bf16.mxu0 %v964_v0 }
  0xc0   :  { %806 = vmatpush3.bf16.msra.mxu0 %v1041_v15 }
  0xc1   :  { %807 = vmatprep.subr.bf16.mxu0 %v964_v0 }
  0xc4   :  { %809 = vmatpush3.bf16.msra.mxu0 %v1047_v18 }
  0xc5   :  { %810 = vmatprep.subr.bf16.mxu0 %v964_v0 }
  0xc8   :  { %812 = vmatpush3.bf16.msra.mxu0 %v1053_v21 }
  0xc9   :  { %813 = vmatprep.subr.bf16.mxu0 %v964_v0 }
  0xcc   :  { %815 = vmatpush3.bf16.msra.mxu0 %v1059_v24 }
  0xcd   :  { %816 = vmatprep.subr.bf16.mxu0 %v964_v0 }
  0xd0   :  { %818 = vmatpush3.bf16.msra.mxu0 %v1065_v27 }
  0xd1   :  { %843 = vmatprep.subr.bf16.mxu0 %v964_v0 }
 0x186   :  { %v131_v36 = vpop.f32.mrb[0].mxu0 }
 0x187   :  { %v135_v37 = vadd.f32 %v131_v36, %v1017_v1  ;;  %v606_v38 = vpop.f32.mrb[1].mxu0 }
 0x189   :  { %v136_v39 = vmul.f32 %v135_v37, %v135_v37 }
 0x18b   :  { %137 = vrot.lane.b32.xlu0 %v136_v39, %s965_s1 }
 0x1fd   :  { %v138_v40 = vpop.permute.xlu0 %137 }
 0x1fe   :  { %v139_v41 = vadd.f32 %v138_v40, %v136_v39 }
 0x200   :  { %v140_v42 = vadd.f32 1e-30, %v139_v41 }
 0x202   :  { %878 = vrsqrt.f32 %v140_v42 }
 0x20c   :  { %v879_v43 = vpop.eup %878 }
 0x20d   :  { %v142_v44 = vmul.f32 0.025, %v879_v43 }
 0x20f   :  { %v143_v45 = vsub.f32 1.0, %v142_v44 }
 0x211   :  { %v144_v46 = vmax.f32 %v143_v45, 0.0 }
 0x213   :  { %v145_v47 = vmul.f32 %v144_v46, %v135_v37 }
 0x215   :  { %640 = vmatmul.mubr.f32.vlgmr.msra.gmra.mrb[0].mxu1 %v145_v47 }
 0x216   :  { %821 = vmatpush3.bf16.msra.mxu1 %v1021_v5  ;;  %709 = vmatprep.mubr.msk.f32.mxu1 %vm966_vm0, %v967_v14 }
 0x217   :  { %822 = vmatprep.subr.bf16.mxu1 %v964_v0 }
 0x21a   :  { %824 = vmatpush3.bf16.msra.mxu1 %v1025_v8 }
 0x21b   :  { %825 = vmatprep.subr.bf16.mxu1 %v964_v0 }
 0x21e   :  { %827 = vmatpush3.bf16.msra.mxu1 %v1031_v11 }
 0x21f   :  { %828 = vmatprep.subr.bf16.mxu1 %v964_v0 }
 0x222   :  { %830 = vmatpush3.bf16.msra.mxu1 %v1041_v15 }
 0x223   :  { %831 = vmatprep.subr.bf16.mxu1 %v964_v0 }
 0x226   :  { %833 = vmatpush3.bf16.msra.mxu1 %v1047_v18 }
 0x227   :  { %834 = vmatprep.subr.bf16.mxu1 %v964_v0 }
 0x22a   :  { %836 = vmatpush3.bf16.msra.mxu1 %v1053_v21 }
 0x22b   :  { %837 = vmatprep.subr.bf16.mxu1 %v964_v0 }
 0x22e   :  { %839 = vmatpush3.bf16.msra.mxu1 %v1059_v24 }
 0x22f   :  { %840 = vmatprep.subr.bf16.mxu1 %v964_v0 }
 0x232   :  { %842 = vmatpush3.bf16.msra.mxu1 %v1065_v27 }
 0x2e8   :  { %v212_v48 = vpop.f32.mrb[0].mxu1 }
 0x2e9   :  { %v216_v49 = vadd.f32 %v212_v48, %v1017_v1  ;;  %v641_v50 = vpop.f32.mrb[1].mxu1 }
 0x2eb   :  { %v217_v51 = vmul.f32 %v216_v49, %v216_v49 }
 0x2ed   :  { %218 = vrot.lane.b32.xlu1 %v217_v51, %s965_s1 }
 0x35f   :  { %v219_v52 = vpop.permute.xlu1 %218 }
 0x360   :  { %v220_v53 = vadd.f32 %v219_v52, %v217_v51 }
 0x362   :  { %v221_v54 = vadd.f32 1e-30, %v220_v53 }
 0x364   :  { %880 = vrsqrt.f32 %v221_v54 }
 0x36e   :  { %v881_v55 = vpop.eup %880 }
 0x36f   :  { %v223_v56 = vmul.f32 0.025, %v881_v55 }
 0x371   :  { %v224_v57 = vsub.f32 1.0, %v223_v56 }
 0x373   :  { %v225_v58 = vmax.f32 %v224_v57, 0.0 }
 0x375   :  { %v226_v59 = vmul.f32 %v225_v58, %v216_v49 }
 0x377   :  { %675 = vmatmul.mubr.f32.vlgmr.msra.gmra.mrb[2].mxu0 %v226_v59 }
 0x378   :  { %845 = vmatpush3.bf16.msra.mxu0 %v1021_v5  ;;  %744 = vmatprep.mubr.msk.f32.mxu0 %vm966_vm0, %v967_v14 }
 0x379   :  { %846 = vmatprep.subr.bf16.mxu0 %v964_v0 }
 0x37c   :  { %848 = vmatpush3.bf16.msra.mxu0 %v1025_v8 }
 0x37d   :  { %849 = vmatprep.subr.bf16.mxu0 %v964_v0 }
 0x380   :  { %851 = vmatpush3.bf16.msra.mxu0 %v1031_v11 }
 0x381   :  { %852 = vmatprep.subr.bf16.mxu0 %v964_v0 }
 0x384   :  { %854 = vmatpush3.bf16.msra.mxu0 %v1041_v15 }
 0x385   :  { %855 = vmatprep.subr.bf16.mxu0 %v964_v0 }
 0x388   :  { %857 = vmatpush3.bf16.msra.mxu0 %v1047_v18 }
 0x389   :  { %858 = vmatprep.subr.bf16.mxu0 %v964_v0 }
 0x38c   :  { %860 = vmatpush3.bf16.msra.mxu0 %v1053_v21 }
 0x38d   :  { %861 = vmatprep.subr.bf16.mxu0 %v964_v0 }
 0x390   :  { %863 = vmatpush3.bf16.msra.mxu0 %v1059_v24 }
 0x391   :  { %864 = vmatprep.subr.bf16.mxu0 %v964_v0 }
 0x394   :  { %866 = vmatpush3.bf16.msra.mxu0 %v1065_v27 }
 0x44a   :  { %v293_v60 = vpop.f32.mrb[2].mxu0 }
 0x44b   :  { %v297_v61 = vadd.f32 %v293_v60, %v1017_v1  ;;  %v676_v62 = vpop.f32.mrb[3].mxu0 }
 0x44d   :  { %v298_v63 = vmul.f32 %v297_v61, %v297_v61 }
 0x44f   :  { %299 = vrot.lane.b32.xlu1 %v298_v63, %s965_s1 }
 0x4c1   :  { %v300_v2 = vpop.permute.xlu1 %299 }
 0x4c2   :  { %v301_v3 = vadd.f32 %v300_v2, %v298_v63 }
 0x4c4   :  { %v302_v4 = vadd.f32 1e-30, %v301_v3 }
 0x4c6   :  { %882 = vrsqrt.f32 %v302_v4 }
 0x4d0   :  { %v883_v5 = vpop.eup %882 }
 0x4d1   :  { %v304_v6 = vmul.f32 0.025, %v883_v5 }
 0x4d3   :  { %v305_v7 = vsub.f32 1.0, %v304_v6 }
 0x4d5   :  { %v306_v8 = vmax.f32 %v305_v7, 0.0 }
 0x4d7   :  { %v307_v9 = vmul.f32 %v306_v8, %v297_v61 }
 0x4d9   :  { %710 = vmatmul.mubr.f32.vlgmr.msra.gmra.mrb[2].mxu1 %v307_v9 }
 0x5ac   :  { %v374_v0 = vpop.f32.mrb[2].mxu1 }
 0x5ad   :  { %v378_v10 = vadd.f32 %v374_v0, %v1017_v1  ;;  %v711_v11 = vpop.f32.mrb[3].mxu1 }
 0x5af   :  { %v379_v12 = vmul.f32 %v378_v10, %v378_v10 }
 0x5b1   :  { %380 = vrot.lane.b32.xlu0 %v379_v12, %s965_s1 }
 0x623   :  { %v381_v13 = vpop.permute.xlu0 %380 }
 0x624   :  { %v382_v14 = vadd.f32 %v381_v13, %v379_v12 }
 0x626   :  { %v383_v15 = vadd.f32 1e-30, %v382_v14 }
 0x628   :  { %884 = vrsqrt.f32 %v383_v15 }
 0x632   :  { %v885_v16 = vpop.eup %884 }
 0x633   :  { %v385_v17 = vmul.f32 0.025, %v885_v16 }
 0x635   :  { %v386_v18 = vsub.f32 1.0, %v385_v17 }
 0x637   :  { %v387_v19 = vmax.f32 %v386_v18, 0.0 }
 0x639   :  { %v388_v20 = vmul.f32 %v387_v19, %v378_v10 }
 0x63b   :  { %745 = vmatmul.mubr.f32.vlgmr.msra.gmra.mrb[4].mxu0 %v388_v20 }
 0x70e   :  { %v455_v21 = vpop.f32.mrb[4].mxu0 }
 0x70f   :  { %v459_v22 = vadd.f32 %v455_v21, %v1017_v1  ;;  %v746_v23 = vpop.f32.mrb[5].mxu0 }
 0x711   :  { %v460_v24 = vmul.f32 %v459_v22, %v459_v22 }
 0x713   :  { %461 = vrot.lane.b32.xlu1 %v460_v24, %s965_s1 }
 0x785   :  { %v462_v25 = vpop.permute.xlu1 %461 }
 0x786   :  { %v463_v26 = vadd.f32 %v462_v25, %v460_v24 }
 0x788   :  { %v464_v27 = vadd.f32 1e-30, %v463_v26 }
 0x78a   :  { %886 = vrsqrt.f32 %v464_v27 }
 0x794   :  { %v887_v28 = vpop.eup %886 }
 0x795   :  { %v466_v29 = vmul.f32 0.025, %v887_v28 }
 0x797   :  { %v467_v30 = vsub.f32 1.0, %v466_v29 }
 0x799   :  { %v468_v31 = vmax.f32 %v467_v30, 0.0 }
 0x79b   :  { %v469_v32 = vmul.f32 %v468_v31, %v459_v22 }
 0x79d   :  { %470 = vst [vmem:[#allocation7] sm:$0xff] %v469_v32 }
 0x79e   :  { %943 = shalt.err (!%p940_p6)
}
 0x79f   :  { %s944_s11 = scalar_lea.hbm %s1151_s2, 128 }
 0x7a0   :  { %p945_p7 = scmp.ne.s32.totalorder %s1151_s2, %s944_s11  ;;  %p948_p8 = scmp.lt.u32.totalorder %s944_s11, %s1151_s2 }
 0x7a2   :  { %p950_p9 = pnand %p948_p8, %p945_p7 }
 0x7a4   :  { %953 = shalt.err (!%p950_p9)
}
 0x7a5   :  { %480 = dma.vmem_to_hbm [thread:$0]  %s478_s7, 128, %s1151_s2, [#allocation4]  }
 0x7a6   :  { %958 = dma.done.wait [#allocation4], 128  }
 0x7a7   :  { %959 = vsyncadd [#allocation4], 4294967168 }
 0x7a8   :  { %484 = vsyncpa [#allocation3], 1 }
 0x7a9   :  { %485 = vsyncpa [#allocation6], 1 }
 0x7aa   :  { %486 = vsyncpa [#allocation4], 1 }

</bundles_post_ra>
